<compile_context>
chip_gen: v6e
topology: v6e:2x2x1
jax: 0.10.0
libtpu: 0.0.40
codegen_flags: <defaults>
</compile_context>

<pallas_src>
import functools

import jax
import jax.numpy as jnp
from jax.experimental import pallas as pl
from jax.experimental.pallas import tpu as pltpu

_LANE_W = 1024  # lane-dense slab width: large multiple of the 128-lane vreg axis


def _dorefa_act_kernel(x_ref, o_ref, *, scale):
    # Pure VPU elementwise work on one VMEM tile; `scale` is a baked-in Python
    # float (a_bit is static).  Op order mirrors the PyTorch module bit-for-bit:
    #   clamp(0.1*x, 0, 1) -> *scale -> round -> /scale  (true divide).
    x = x_ref[...].astype(jnp.float32)
    y = jnp.clip(x * jnp.float32(0.1), 0.0, 1.0)
    q = jnp.round(y * jnp.float32(scale)) / jnp.float32(scale)
    o_ref[...] = q.astype(o_ref.dtype)


def _block_budget():
    """Generation-aware (block_bytes, explicit_vmem_limit_or_None)."""
    kind = ""
    try:
        kind = jax.devices()[0].device_kind.lower()
    except Exception:
        pass
    if "v7" in kind or "tpu7" in kind:
        # v7x: HBM ~2.3x v6e -> fewer, bigger steps pay off.  8 MiB blocks =
        # 32 MiB in+out double-buffered; cap VMEM explicitly (64 MiB phys/TC).
        return 8 << 20, 40 << 20
    if "v6" in kind:
        # v6e: 4 MiB blocks -> 16 MiB double-buffered, under 32 MiB scoped default.
        return 4 << 20, None
    # v5e / unknown: 2 MiB blocks -> 8 MiB, under the 16 MiB scoped default.
    return 2 << 20, None


def _quantize_jnp(x, scale):
    # Fused-XLA fallback for tiny tensors and sub-row tails (same math).
    y = jnp.clip(jnp.float32(0.1) * x.astype(jnp.float32), 0.0, 1.0)
    return (jnp.round(y * jnp.float32(scale)) / jnp.float32(scale)).astype(x.dtype)


def dorefa_activation_quantize(x, a_bit, full_pretrain=False, *,
                               min_kernel_bytes=256 * 1024):
    """Forward of activation_quantize_fn. x: any shape (e.g. NCHW)."""
    if full_pretrain:
        return x  # identity path of the module

    scale = float(2 ** a_bit - 1)
    orig_shape = x.shape
    orig_dtype = x.dtype
    total = int(x.size)
    itemsize = jnp.dtype(orig_dtype).itemsize

    # Small-tensor fall-through: pallas_call launch/wrapper overhead dominates;
    # XLA already streams this elementwise chain at roofline in one pass.
    if total * itemsize < min_kernel_bytes:
        return _quantize_jnp(x, scale)

    # dtype-aware sublane granularity: 8 for f32, 16 for bf16, 32 for int8/fp8.
    sublane = max(8, 32 // itemsize)

    x_flat = x.reshape(-1)
    main_rows = total // _LANE_W          # lane-aligned bulk rows
    main_elems = main_rows * _LANE_W
    tail_elems = total - main_elems       # < 1024 remainder elements

    if main_rows < sublane:
        # Not enough lane-dense rows for a sensible tile.
        return _quantize_jnp(x, scale)

    block_bytes, vmem_cap = _block_budget()
    max_block_rows = max(
        sublane, (block_bytes // (_LANE_W * itemsize)) // sublane * sublane)

    block_rows = min(max_block_rows, pl.cdiv(main_rows, sublane) * sublane)
    num_blocks = pl.cdiv(main_rows, block_rows)
    # Give the megacore (v7x: 2 TCs) at least two blocks to shard when possible.
    if num_blocks < 2 and main_rows >= 2 * sublane:
        block_rows = pl.cdiv(pl.cdiv(main_rows, 2), sublane) * sublane
        num_blocks = pl.cdiv(main_rows, block_rows)
    # Trailing partial blocks are handled by Pallas (OOB reads unspecified,
    # OOB writes dropped) — harmless for this elementwise kernel.

    x_main = x_flat[:main_elems] if tail_elems else x_flat
    x2 = x_main.reshape(main_rows, _LANE_W)

    cp_kwargs = dict(dimension_semantics=("parallel",))  # megacore-shardable
    if vmem_cap is not None:
        cp_kwargs["vmem_limit_bytes"] = int(vmem_cap)

    kernel = functools.partial(_dorefa_act_kernel, scale=scale)
    out2 = pl.pallas_call(
        kernel,
        out_shape=jax.ShapeDtypeStruct((main_rows, _LANE_W), orig_dtype),
        grid=(num_blocks,),
        in_specs=[pl.BlockSpec((block_rows, _LANE_W), lambda i: (i, 0))],
        out_specs=pl.BlockSpec((block_rows, _LANE_W), lambda i: (i, 0)),
        compiler_params=pltpu.CompilerParams(**cp_kwargs),
        cost_estimate=pl.CostEstimate(
            flops=6 * main_elems,
            transcendentals=0,
            bytes_accessed=2 * main_elems * itemsize),
    )(x2)

    if tail_elems == 0:
        return out2.reshape(orig_shape)

    # Tiny (<1024-element) remainder handled by plain jnp, then stitched.
    out_tail = _quantize_jnp(x_flat[main_elems:], scale)
    return jnp.concatenate([out2.reshape(-1), out_tail]).reshape(orig_shape)


def _reference(x, a_bit):
    # Pure-JAX mirror of the PyTorch forward (dorefa_a + DoReFaQuantizeSTE.forward).
    scale = 2 ** a_bit - 1
    y = jnp.clip(0.1 * x, 0.0, 1.0)
    return jnp.round(y * scale) / scale


# TODO(synk): the DoReFaQuantizeSTE straight-through backward (custom gradient)
# is training-only and has no forward-pass Pallas equivalent; only forward is kernelized.

if __name__ == "__main__":
    a_bit = 4
    key = jax.random.PRNGKey(0)
    k1, k2, k3 = jax.random.split(key, 3)

    # (1) Small NCHW activation as fed to activation_quantize_fn.  Below the
    #     small-tensor threshold -> fused-jnp fall-through (identical math).
    x_small = jax.random.normal(k1, (2, 4, 16, 16), dtype=jnp.float32)
    out_small = jax.block_until_ready(dorefa_activation_quantize(x_small, a_bit))
    assert out_small.shape == x_small.shape and out_small.dtype == x_small.dtype
    assert jnp.allclose(out_small, _reference(x_small, a_bit), atol=1e-6, rtol=1e-6)

    # (2) Force the Pallas kernel path (lane-aligned bulk, no tail, 2 grid blocks).
    x_kern = jax.random.normal(k2, (2, 8, 32, 32), dtype=jnp.float32)  # 16 * 1024 elems
    out_kern = jax.block_until_ready(
        dorefa_activation_quantize(x_kern, a_bit, min_kernel_bytes=0))
    assert out_kern.shape == x_kern.shape and out_kern.dtype == x_kern.dtype
    assert jnp.allclose(out_kern, _reference(x_kern, a_bit), atol=1e-6, rtol=1e-6)

    # (3) Ragged size: kernel streams the lane-aligned bulk, jnp handles the tail.
    x_rag = jax.random.normal(k3, (2, 8, 32, 33), dtype=jnp.float32)   # 16*1024 + 512
    out_rag = jax.block_until_ready(
        dorefa_activation_quantize(x_rag, a_bit, min_kernel_bytes=0))
    assert out_rag.shape == x_rag.shape and out_rag.dtype == x_rag.dtype
    assert jnp.allclose(out_rag, _reference(x_rag, a_bit), atol=1e-6, rtol=1e-6)

    # (4) Identity (full_pretrain) path sanity check.
    out_id = dorefa_activation_quantize(x_small, a_bit, full_pretrain=True)
    assert jnp.array_equal(out_id, x_small)

    print("KERNEL_OK")
</pallas_src>

<mosaic_0001>
module attributes {stable_mosaic.version = 11 : i64} {
  func.func @_dorefa_act_kernel(%arg0: i32, %arg1: memref<8x1024xf32, #tpu.memory_space<vmem>>, %arg2: memref<8x1024xf32, #tpu.memory_space<vmem>>) attributes {dimension_semantics = [#tpu.dimension_semantics<parallel>], iteration_bounds = array<i64: 2>, scalar_prefetch = 0 : i64, scratch_operands = 0 : i64, tpu.core_type = #tpu.core_type<tc>, window_params = [{transform_indices = @transform_0, window_bounds = array<i64: 8, 1024>}, {transform_indices = @transform_1, window_bounds = array<i64: 8, 1024>}]} {
    %c0 = arith.constant 0 : index
    %c0_0 = arith.constant 0 : index
    %0 = vector.load %arg1[%c0, %c0_0] : memref<8x1024xf32, #tpu.memory_space<vmem>>, vector<8x1024xf32>
    %cst = arith.constant 1.000000e-01 : f32
    %1 = vector.broadcast %cst : f32 to vector<8x1024xf32>
    %2 = arith.mulf %0, %1 : vector<8x1024xf32>
    %cst_1 = arith.constant 0.000000e+00 : f32
    %cst_2 = arith.constant 1.000000e+00 : f32
    %3 = vector.broadcast %cst_1 : f32 to vector<8x1024xf32>
    %4 = arith.maximumf %3, %2 : vector<8x1024xf32>
    %5 = vector.broadcast %cst_2 : f32 to vector<8x1024xf32>
    %6 = arith.minimumf %5, %4 : vector<8x1024xf32>
    %cst_3 = arith.constant 1.500000e+01 : f32
    %7 = vector.broadcast %cst_3 : f32 to vector<8x1024xf32>
    %8 = arith.mulf %6, %7 : vector<8x1024xf32>
    %9 = math.roundeven %8 : vector<8x1024xf32>
    %cst_4 = arith.constant 1.500000e+01 : f32
    %10 = vector.broadcast %cst_4 : f32 to vector<8x1024xf32>
    %11 = arith.divf %9, %10 : vector<8x1024xf32>
    %c0_5 = arith.constant 0 : index
    %c0_6 = arith.constant 0 : index
    %12 = vector.load %arg2[%c0_5, %c0_6] : memref<8x1024xf32, #tpu.memory_space<vmem>>, vector<8x1024xf32>
    tpu.vector_store %arg2[%c0_5, %c0_6], %11 {strides = array<i32>} : memref<8x1024xf32, #tpu.memory_space<vmem>>, vector<8x1024xf32>,
    return
  }
  func.func @transform_0(%arg0: i32) -> (i32, i32) {
    %c0_i32 = arith.constant 0 : i32
    %c0_i32_0 = arith.constant 0 : i32
    return %arg0, %c0_i32 : i32, i32
  }
  func.func @transform_1(%arg0: i32) -> (i32, i32) {
    %c0_i32 = arith.constant 0 : i32
    %c0_i32_0 = arith.constant 0 : i32
    return %arg0, %c0_i32 : i32, i32
  }
}

</mosaic_0001>

<bundles_post_ra>
// kernel: tpu_custom_call.1
= control target key start
LH: loop header
LB: loop body
LE: loop exit
PB: predicated region body
PF: predicated region fallthrough
CT: control target
= control target key end

     0   :  { %6 = vsyncpa [#allocation3], 0  ;;  %s704_s0 = inlined_call_operand.hbm [shape: f32[16,1024], index: 0, kind: input, shape index: {}]   ;;  %s705_s1 = inlined_call_operand.hbm [shape: f32[16,1024], index: 1, kind: output, shape index: {}]  }
   0x1   :  { %8 = vsyncpa [#allocation3 + $0x1], 0 }
   0x2   :  { %9 = vsyncpa [#allocation4], 0 }
   0x3   :  { %11 = vsyncpa [#allocation4 + $0x1], 0  ;;  %s515_s6 = smov 0   ;;  %s517_s7 = smov 0  }
   0x4   :  { %s519_s8 = smov 0   ;;  %s521_s9 = smov 0  }
   0x5 LB: > { %s536_s10 = sadd.s32 4294967295, %s501_s9   ;;  %s283_s11 = sadd.s32 4294967294, %s501_s9   ;;  %s501_s9 = sphi %s521_s9, %s732_s9   ;;  %s497_s8 = sphi %s519_s8, %s731_s8   ;;  %s493_s7 = sphi %s517_s7, %s730_s7   ;;  %s489_s6 = sphi %s515_s6, %s729_s6  }
   0x6   : > { %s540_s12 = sadd.s32 1, %s501_s9   ;;  %s24_s13 = sadd.s32 1, %s497_s8 }
   0x7   : > { %s21_s14 = ssub.s32 %s501_s9, %s540_s12  ;;  %p31_p0 = scmp.ne.s32.totalorder %s497_s8, %s493_s7 }
   0x8   : > { %p22_p1 = scmp.eq.s32.totalorder %s21_s14, 0  ;;  %p32_p2 = scmp.eq.s32.totalorder %s501_s9, 0 }
   0x9   : > { %p37_p3 = scmp.ne.s32.totalorder %s493_s7, %s489_s6  ;;  %p38_p4 = scmp.eq.s32.totalorder %s536_s10, 0 }
   0xa   : > { %s552_s15 = scalar_select %p22_p1, %s497_s8, %s24_s13  }
   0xb   : > { %p554_p5 = por %p32_p2, %p31_p0  ;;  %p558_p6 = por %p38_p4, %p37_p3 }
   0xc   : > { %p61_p7 = scmp.eq.s32.totalorder %s536_s10, 1  ;;  %p67_p8 = scmp.eq.s32.totalorder %s283_s11, 1 }
   0xd   : > { %s709_s17 = scalar_select %p558_p6, 1, 0 }
   0xe   : > { %p375_p10 = scmp.lt.s32.totalorder %s501_s9, 2  ;;  %p565_p11 = por %p61_p7, %p31_p0 }
   0xf   : > { %p569_p12 = por %p67_p8, %p37_p3  ;;  %s87_s20 = sand.u32 1, %s497_s8  }
  0x10   : > { %s710_s18 = scalar_select %p565_p11, 1, 0 }
  0x11   : > { %s711_s19 = scalar_select %p569_p12, 1, 0 }
  0x12   : > { %s297_s21 = sshll.u32 %s501_s9, 10  ;;  %s286_s22 = sshll.u32 %s87_s20, 6 }
  0x13   : > { %s578_s25 = scalar_lea.hbm %s704_s0, %s297_s21  ;;  %s91_s26 = scalar_lea.vmem [#allocation2], %s286_s22 }
  0x14   : > { %s99_s27 = sshll.u32 %s91_s26, 4  ;;  %p582_p13 = pnand %p375_p10, %p554_p5  ;;  %s586_s27 = int_to_ptr.vmem [resolvable:$true] %s99_s27 }
  0x15   : > { %s88_s29 = scalar_lea.sflag [#allocation3], %s87_s20  ;;  %s409_s30 = scalar_lea.hbm %s578_s25, 1024 }
  0x16   : > { %p410_p2 = scmp.ne.s32.totalorder %s578_s25, %s409_s30  ;;  %p411_p3 = pneg %p582_p13 }
  0x17   : > { %s414_s4 = scalar_lea.hbm %s704_s0, 2048  ;;  %p415_p5 = scmp.lt.s32.totalorder %s578_s25, %s704_s0 }
  0x18   : > { %p412_p4 = pnand %p411_p3, %p410_p2  ;;  %p416_p8 = scmp.lt.s32.totalorder %s414_s4, %s409_s30 }
  0x1a   : > { %p413_p7 = pneg %p412_p4  ;;  %p417_p10 = por %p416_p8, %p415_p5 }
  0x1c   : > { %p418_p9 = pnand %p417_p10, %p413_p7 }
  0x1e   : > { %421 = shalt.err (!%p418_p9)
}
  0x1f   : > { %s422_s13 = scalar_lea.vmem %s586_s27, 1024  ;;  %s503_s14 = smov [#allocation2]  }
  0x20   : > { %p423_p0 = scmp.ne.s32.totalorder %s586_s27, %s422_s13  ;;  %s427_s16 = sshll.u32 %s503_s14, 4  ;;  %s428_s16 = int_to_ptr.vmem [resolvable:$false] %s427_s16 }
  0x21   : > { %s429_s20 = scalar_lea.vmem %s428_s16, 2048  ;;  %p430_p4 = scmp.lt.s32.totalorder %s586_s27, %s428_s16 }
  0x22   : > { %p425_p1 = pnand %p423_p0, %p411_p3  ;;  %p431_p12 = scmp.lt.s32.totalorder %s429_s20, %s422_s13 }
  0x24   : > { %p426_p2 = pneg %p425_p1  ;;  %p432_p11 = por %p431_p12, %p430_p4 }
  0x26   : > { %p433_p6 = pnand %p432_p11, %p426_p2 }
  0x28   : > { %436 = shalt.err (!%p433_p6)
}
  0x29   : > { %370 = dma.hbm_to_vmem [thread:$0]  (!%p582_p13), %s578_s25, 1024, %s586_s27, %s88_s29  }
  0x2a   : > { %p713_p9 = scmp.lt.s32.totalorder %s501_s9, 3  ;;  %p714_p7 = scmp.ge.s32.totalorder %s501_s9, 1 }
  0x2c   : > { %p105_p0 = pnand %p714_p7, %p713_p9 }
  0x2d   : > { %s613_s21 = sand.u32 (!%p105_p0), 1, %s493_s7   ;;  %p715_p6 = scmp.ne.s32.totalorder (!%p105_p0), %s709_s17, 0 }
  0x2e   : > { %108 = sbr.rel (%p105_p0) target bundleno = 102 (0x66), region = 24  ;;  %s290_s22 = sshll.u32 (!%p105_p0), %s613_s21, 6 }
  0x2f   : > { %s111_s23 = scalar_lea.sflag (!%p105_p0), [#allocation3], %s613_s21  ;;  %s114_s24 = scalar_lea.vmem (!%p105_p0), [#allocation2], %s290_s22 }
  0x33   : > { %480 = dma.done.wait (%p715_p6), %s111_s23, 1024  }
  0x34   : > { %482 = vsyncadd (%p715_p6), %s111_s23, 4294966272  ;;  %v133_v0 = vld [vmem:[%s114_s24] sm:$0xff]  ;;  %v134_v1 = vld [vmem:[%s114_s24 + $0x8] sm:$0xff]  ;;  %s650_s17 = scalar_lea.vmem [#allocation5], %s290_s22  ;;  %s298_s25 = sshll.u32 %s536_s10, 10 }
  0x35   : > { %v135_v2 = vld [vmem:[%s114_s24 + $0x10] sm:$0xff]  ;;  %v141_v3 = vmul.f32 0.1, %v133_v0  ;;  %v142_v4 = vmul.f32 0.1, %v134_v1  ;;  %v136_v6 = vld [vmem:[%s114_s24 + $0x18] sm:$0xff]  ;;  %s211_s29 = scalar_lea.hbm %s705_s1, %s298_s25 }
  0x36   : > { %v143_v5 = vmul.f32 0.1, %v135_v2  ;;  %v137_v7 = vld [vmem:[%s114_s24 + $0x20] sm:$0xff]  ;;  %v138_v8 = vld [vmem:[%s114_s24 + $0x28] sm:$0xff]  ;;  %v144_v12 = vmul.f32 0.1, %v136_v6 }
  0x37   : > { %v149_v9 = vmax.f32 %v141_v3, 0.0  ;;  %v150_v10 = vmax.f32 %v142_v4, 0.0  ;;  %v139_v13 = vld [vmem:[%s114_s24 + $0x30] sm:$0xff]  ;;  %v145_v14 = vmul.f32 0.1, %v137_v7  ;;  %v140_v21 = vld [vmem:[%s114_s24 + $0x38] sm:$0xff] }
  0x38   : > { %v151_v11 = vmax.f32 %v143_v5, 0.0  ;;  %v146_v15 = vmul.f32 0.1, %v138_v8  ;;  %v147_v16 = vmul.f32 0.1, %v139_v13  ;;  %v152_v20 = vmax.f32 %v144_v12, 0.0 }
  0x39   : > { %v157_v17 = vmin.f32 %v149_v9, 1.0  ;;  %v158_v18 = vmin.f32 %v150_v10, 1.0  ;;  %v153_v22 = vmax.f32 %v145_v14, 0.0  ;;  %v623_v25 = vmul.f32 0.1, %v140_v21  ;;  %s213_s26 = sshll.u32 %s650_s17, 4  ;;  %s214_s26 = int_to_ptr.vmem [resolvable:$true] %s213_s26 }
  0x3a   : > { %v159_v19 = vmin.f32 %v151_v11, 1.0  ;;  %v154_v23 = vmax.f32 %v146_v15, 0.0  ;;  %v155_v24 = vmax.f32 %v147_v16, 0.0  ;;  %v160_v29 = vmin.f32 %v152_v20, 1.0  ;;  %s199_s30 = scalar_lea.sflag [#allocation4], %s613_s21  ;;  %s437_s2 = scalar_lea.vmem %s214_s26, 1024 }
  0x3b   : > { %v165_v26 = vmul.f32 15.0, %v157_v17  ;;  %v166_v27 = vmul.f32 15.0, %v158_v18  ;;  %v161_v30 = vmin.f32 %v153_v22, 1.0  ;;  %v156_v36 = vmax.f32 %v623_v25, 0.0  ;;  %p438_p11 = scmp.ne.s32.totalorder %s214_s26, %s437_s2  ;;  %p726_p12 = scmp.ne.s32.totalorder %s710_s18, 0 }
  0x3c   : > { %v167_v28 = vmul.f32 15.0, %v159_v19  ;;  %v162_v31 = vmin.f32 %v154_v23, 1.0  ;;  %v163_v32 = vmin.f32 %v155_v24, 1.0  ;;  %v168_v48 = vmul.f32 15.0, %v160_v29  ;;  %s504_s3 = smov [#allocation5]  }
  0x3d   : > { %v299_v33 = vand.u32 2147483647, %v165_v26  ;;  %v301_v34 = vcvt.f32.s32 %v165_v26  ;;  %v307_v35 = vand.u32 2147483647, %v166_v27  ;;  %v304_v37 = vand.u32 2147483648, %v165_v26  ;;  %p439_p13 = pnand %p438_p11, %p726_p12  ;;  %s441_s4 = sshll.u32 %s504_s3, 4  ;;  %s442_s4 = int_to_ptr.vmem [resolvable:$false] %s441_s4 }
  0x3e   : > { %v309_v38 = vcvt.f32.s32 %v166_v27  ;;  %v315_v39 = vand.u32 2147483647, %v167_v28  ;;  %v317_v40 = vcvt.f32.s32 %v167_v28  ;;  %v312_v44 = vand.u32 2147483648, %v166_v27  ;;  %s443_s5 = scalar_lea.vmem %s442_s4, 2048  ;;  %p444_p3 = scmp.lt.s32.totalorder %s214_s26, %s442_s4 }
  0x3f   : > { %vm626_vm0 = vcmp.lt.f32.partialorder %v299_v33, 8388608.0  ;;  %v302_v42 = vcvt.s32.f32 %v301_v34  ;;  %vm630_vm1 = vcmp.lt.f32.partialorder %v307_v35, 8388608.0  ;;  %v320_v47 = vand.u32 2147483648, %v167_v28  ;;  %p440_p1 = pneg %p439_p13  ;;  %p445_p5 = scmp.lt.s32.totalorder %s443_s5, %s437_s2 }
  0x40   : > { %v310_v45 = vcvt.s32.f32 %v309_v38  ;;  %v318_v46 = vcvt.s32.f32 %v317_v40  ;;  %vm634_vm2 = vcmp.lt.f32.partialorder %v315_v39, 8388608.0  ;;  %v169_v51 = vmul.f32 15.0, %v161_v30 }
  0x41   : > { %v303_v49 = vand.u32 2147483647, %v302_v42  ;;  %v170_v52 = vmul.f32 15.0, %v162_v31  ;;  %v323_v55 = vand.u32 2147483647, %v168_v48  ;;  %v325_v56 = vcvt.f32.s32 %v168_v48  ;;  %p446_p8 = por %p445_p5, %p444_p3 }
  0x42   : > { %v311_v53 = vand.u32 2147483647, %v310_v45  ;;  %v319_v54 = vand.u32 2147483647, %v318_v46  ;;  %v328_v58 = vand.u32 2147483648, %v168_v48  ;;  %v333_v59 = vcvt.f32.s32 %v169_v51 }
  0x43   : > { %v305_v57 = vor.u32 %v304_v37, %v303_v49  ;;  %v171_v60 = vmul.f32 15.0, %v163_v32  ;;  %v326_v63 = vcvt.s32.f32 %v325_v56  ;;  %v331_v0 = vand.u32 2147483647, %v169_v51  ;;  %p447_p10 = pnand %p446_p8, %p440_p1 }
  0x44   : > { %v313_v61 = vor.u32 %v312_v44, %v311_v53  ;;  %v321_v62 = vor.u32 %v320_v47, %v319_v54  ;;  %vm640_vm3 = vcmp.lt.f32.partialorder %v323_v55, 8388608.0  ;;  %v334_v3 = vcvt.s32.f32 %v333_v59 }
  0x45   : > { %v306_v1 = vsel %vm626_vm0, %v305_v57, %v165_v26  ;;  %v336_v4 = vand.u32 2147483648, %v169_v51  ;;  %v327_v8 = vand.u32 2147483647, %v326_v63  ;;  %v341_v12 = vcvt.f32.s32 %v170_v52 }
  0x46   : > { %v182_v5 = vmul.f32 0.06666667, %v306_v1  ;;  %v314_v6 = vsel %vm630_vm1, %v313_v61, %v166_v27  ;;  %v322_v7 = vsel %vm634_vm2, %v321_v62, %v167_v28  ;;  %v335_v11 = vand.u32 2147483647, %v334_v3 }
  0x47   : > { %v183_v9 = vmul.f32 0.06666667, %v314_v6  ;;  %v184_v10 = vmul.f32 0.06666667, %v322_v7  ;;  %v329_v13 = vor.u32 %v328_v58, %v327_v8  ;;  %vm653_vm4 = vcmp.lt.f32.partialorder %v331_v0, 8388608.0 }
  0x48   : > { %190 = vst [vmem:[%s650_s17] sm:$0xff] %v182_v5  ;;  %v339_v15 = vand.u32 2147483647, %v170_v52  ;;  %v337_v16 = vor.u32 %v336_v4, %v335_v11  ;;  %v342_v17 = vcvt.s32.f32 %v341_v12  ;;  %v344_v18 = vand.u32 2147483648, %v170_v52 }
  0x49   : > { %191 = vst [vmem:[%s650_s17 + $0x8] sm:$0xff] %v183_v9  ;;  %192 = vst [vmem:[%s650_s17 + $0x10] sm:$0xff] %v184_v10  ;;  %v349_v19 = vcvt.f32.s32 %v171_v60  ;;  %v330_v20 = vsel %vm640_vm3, %v329_v13, %v168_v48  ;;  %v347_v21 = vand.u32 2147483647, %v171_v60  ;;  %v352_v22 = vand.u32 2147483648, %v171_v60 }
  0x4a   : > { %v164_v23 = vmin.f32 %v156_v36, 1.0  ;;  %v185_v24 = vmul.f32 0.06666667, %v330_v20  ;;  %v338_v25 = vsel %vm653_vm4, %v337_v16, %v169_v51  ;;  %v343_v26 = vand.u32 2147483647, %v342_v17 }
  0x4b   : > { %v350_v27 = vcvt.s32.f32 %v349_v19  ;;  %v186_v28 = vmul.f32 0.06666667, %v338_v25  ;;  %vm340_vm5 = vcmp.lt.f32.partialorder %v339_v15, 8388608.0  ;;  %vm348_vm6 = vcmp.lt.f32.partialorder %v347_v21, 8388608.0 }
  0x4c   : > { %v172_v29 = vmul.f32 15.0, %v164_v23  ;;  %193 = vst [vmem:[%s650_s17 + $0x18] sm:$0xff] %v185_v24  ;;  %v345_v30 = vor.u32 %v344_v18, %v343_v26 }
  0x4d   : > { %v351_v31 = vand.u32 2147483647, %v350_v27  ;;  %194 = vst [vmem:[%s650_s17 + $0x20] sm:$0xff] %v186_v28 }
  0x4e   : > { %v357_v32 = vcvt.f32.s32 %v172_v29  ;;  %v346_v33 = vsel %vm340_vm5, %v345_v30, %v170_v52  ;;  %v355_v35 = vand.u32 2147483647, %v172_v29  ;;  %v360_v38 = vand.u32 2147483648, %v172_v29 }
  0x4f   : > { %v353_v34 = vor.u32 %v352_v22, %v351_v31  ;;  %v187_v36 = vmul.f32 0.06666667, %v346_v33 }
  0x50   : > { %v358_v37 = vcvt.s32.f32 %v357_v32  ;;  %vm356_vm7 = vcmp.lt.f32.partialorder %v355_v35, 8388608.0 }
  0x51   : > { %v354_v39 = vsel %vm348_vm6, %v353_v34, %v171_v60  ;;  %195 = vst [vmem:[%s650_s17 + $0x28] sm:$0xff] %v187_v36 }
  0x52   : > { %v188_v40 = vmul.f32 0.06666667, %v354_v39  ;;  %v359_v41 = vand.u32 2147483647, %v358_v37 }
  0x54   : > { %196 = vst [vmem:[%s650_s17 + $0x30] sm:$0xff] %v188_v40  ;;  %v361_v42 = vor.u32 %v360_v38, %v359_v41 }
  0x56   : > { %v362_v43 = vsel %vm356_vm7, %v361_v42, %v172_v29 }
  0x57   : > { %v189_v44 = vmul.f32 0.06666667, %v362_v43 }
  0x59   : > { %197 = vst [vmem:[%s650_s17 + $0x38] sm:$0xff] %v189_v44 }
  0x5a   : > { %450 = shalt.err (!%p447_p10)
}
  0x5b   : > { %s451_s10 = scalar_lea.hbm %s211_s29, 1024  ;;  %s455_s14 = scalar_lea.hbm %s705_s1, 2048 }
  0x5c   : > { %p452_p2 = scmp.ne.s32.totalorder %s211_s29, %s451_s10  ;;  %p456_p7 = scmp.lt.s32.totalorder %s211_s29, %s705_s1 }
  0x5d   : > { %p457_p0 = scmp.lt.s32.totalorder %s455_s14, %s451_s10 }
  0x5e   : > { %p453_p4 = pnand %p452_p2, %p726_p12 }
  0x5f   : > { %p458_p6 = por %p457_p0, %p456_p7 }
  0x60   : > { %p454_p9 = pneg %p453_p4 }
  0x62   : > { %p459_p11 = pnand %p458_p6, %p454_p9 }
  0x64   : > { %462 = shalt.err (!%p459_p11)
}
  0x65   : > { %365 = dma.vmem_to_hbm [thread:$0]  (%p726_p12), %s214_s26, 1024, %s211_s29, %s199_s30  }
  0x66 PF: > { %s225_s21 = sand.u32 1, %s489_s6   ;;  %p727_p13 = scmp.ne.s32.totalorder %s711_s19, 0 }
  0x67   : > { %p728_p1 = scmp.ge.s32.totalorder %s501_s9, 2  ;;  %s226_s22 = scalar_lea.sflag [#allocation4], %s225_s21 }
  0x69   : > { %p372_p3 = pnand %p728_p1, %p727_p13 }
  0x6b   : > { %p373_p5 = pneg %p372_p3 }
  0x6d   : > { %484 = dma.done.wait (%p373_p5), %s226_s22, 1024  }
  0x6e   : > { %486 = vsyncadd (%p373_p5), %s226_s22, 4294966272  ;;  %p14_p8 = scmp.ge.s32.totalorder %s540_s12, 4   ;;  %s729_s6 = smov %s493_s7 }
  0x6f   : > { %s730_s7 = smov %s497_s8  ;;  %s731_s8 = smov %s552_s15 }
  0x70   : > { %s732_s9 = smov %s540_s12  ;;  %16 = sbr.rel (!%p14_p8) target bundleno = 5 (0x5), region = 69 }
  0x75   :  { %231 = vsyncpa [#allocation3], 1 }
  0x76   :  { %233 = vsyncpa [#allocation3 + $0x1], 1 }
  0x77   :  { %234 = vsyncpa [#allocation4], 1 }
  0x78   :  { %236 = vsyncpa [#allocation4 + $0x1], 1 }

</bundles_post_ra>
